<compile_context>
chip_gen: v7x
topology: tpu7x:2x2x1
jax: 0.10.0
libtpu: 0.0.40
codegen_flags: <defaults>
</compile_context>

<pallas_src>
import math

import jax
import jax.numpy as jnp
import numpy as np
from jax.experimental import pallas as pl
from jax.experimental.pallas import tpu as pltpu

_MiB = 1024 * 1024
# Only raise the scoped-VMEM limit when we actually need more than the
# smallest per-generation default (v5e: 16 MiB); never ask for more than
# 48 MiB so v7x (64 MiB physical per TensorCore) keeps headroom.
_VMEM_SAFE_DEFAULT = 12 * _MiB
_VMEM_MAX = 48 * _MiB


def _divisors(n):
    return [d for d in range(1, n + 1) if n % d == 0]


def _maybe_vmem_limit(need_bytes):
    if need_bytes <= _VMEM_SAFE_DEFAULT:
        return None
    return int(min(_VMEM_MAX, need_bytes + 8 * _MiB))


def _compiler_params(dimension_semantics, vmem_need_bytes):
    kwargs = dict(dimension_semantics=dimension_semantics)
    limit = _maybe_vmem_limit(vmem_need_bytes)
    if limit is not None:
        kwargs["vmem_limit_bytes"] = limit
    return pltpu.CompilerParams(**kwargs)


# ---------------------------------------------------------------------------
# Pass 1: cumsums over H and W (+ optional normalize), Bb masks per grid step.
# ---------------------------------------------------------------------------
def _make_cumsum_kernel(Bb, H, W, normalize, scale, compute_dtype):
    eps = 1e-6

    def kernel(mask_ref, lower_ref, upper_ref, out_ref):
        m = mask_ref[...].astype(compute_dtype)            # (Bb, H, W)
        # cumsum over W for the whole block: one tall MXU matmul
        #   (Bb*H, W) @ (W, W) upper-triangular ones.
        x = jnp.dot(m.reshape(Bb * H, W), upper_ref[...],
                    preferred_element_type=jnp.float32).reshape(Bb, H, W)
        if normalize:
            x = x * (scale / (x[:, :, W - 1:W] + eps))
        # cumsum over H: (H, H) lower-triangular ones @ (H, W), short unroll.
        for i in range(Bb):
            y = jnp.dot(lower_ref[...], m[i],
                        preferred_element_type=jnp.float32)
            if normalize:
                y = y * (scale / (y[H - 1:H, :] + eps))
            out_ref[i, 0] = y
            out_ref[i, 1] = x[i]

    return kernel


def _cumsum_embeds(mask, normalize, scale, compute_dtype):
    """mask: (B, H, W) float. Returns (B, 2, H, W) f32: [:,0]=y_embed, [:,1]=x_embed."""
    B, H, W = mask.shape
    lower = jnp.asarray(np.tril(np.ones((H, H), np.float32)), dtype=compute_dtype)
    upper = jnp.asarray(np.triu(np.ones((W, W), np.float32)), dtype=compute_dtype)

    # Batch several masks per grid step to amortize the ~0.35 us/step overhead;
    # keep the in-kernel unroll short.
    per_b_bytes = H * W * (mask.dtype.itemsize + 2 * 4)   # mask block + (2,H,W) f32 out
    cands = [d for d in _divisors(B) if d <= 8 and d * per_b_bytes <= 4 * _MiB]
    Bb = max(cands) if cands else 1

    tri_bytes = (H * H + W * W) * jnp.dtype(compute_dtype).itemsize
    if tri_bytes >= 2 * _MiB:
        # Constant index_map across the grid: a second buffer is wasted VMEM
        # (only matters for very large H/W, relevant on v7x's 64 MiB VMEM).
        lower_spec = pl.BlockSpec((H, H), lambda b: (0, 0),
                                  pipeline_mode=pl.Buffered(1))
        upper_spec = pl.BlockSpec((W, W), lambda b: (0, 0),
                                  pipeline_mode=pl.Buffered(1))
        tri_vmem = tri_bytes
    else:
        lower_spec = pl.BlockSpec((H, H), lambda b: (0, 0))
        upper_spec = pl.BlockSpec((W, W), lambda b: (0, 0))
        tri_vmem = 2 * tri_bytes

    vmem_need = 2 * Bb * per_b_bytes + tri_vmem

    kernel = _make_cumsum_kernel(Bb, H, W, normalize, scale, compute_dtype)
    yx = pl.pallas_call(
        kernel,
        out_shape=jax.ShapeDtypeStruct((B, 2, H, W), jnp.float32),
        grid_spec=pltpu.PrefetchScalarGridSpec(
            num_scalar_prefetch=0,
            grid=(B // Bb,),
            in_specs=[
                pl.BlockSpec((Bb, H, W), lambda b: (b, 0, 0)),
                lower_spec,
                upper_spec,
            ],
            out_specs=pl.BlockSpec((Bb, 2, H, W), lambda b: (b, 0, 0, 0)),
        ),
        compiler_params=_compiler_params(("parallel",), vmem_need),
    )(mask, lower, upper)
    return yx


# ---------------------------------------------------------------------------
# Pass 2: lane-dense sin over (Bb, 2, Ft, HWt) blocks. One sin per output elem.
# ---------------------------------------------------------------------------
def _sincos_kernel(emb_ref, inv_ref, phase_ref, out_ref):
    # (Bb,2,1,HWt) * (1,1,Ft,1) + (1,1,Ft,1) -> (Bb,2,Ft,HWt); full-width stores.
    # cos(a) == sin(a + pi/2): exactly one EUP transcendental per element.
    out_ref[...] = jnp.sin(emb_ref[...] * inv_ref[...] + phase_ref[...])


def _pick_tiles(B, F, HW, budget_bytes=8 * _MiB):
    """Pick (Bb, Ft, HWt). 8 MiB output blocks keep the ~0.35 us per-grid-step
    overhead to ~5% (v5e/v6e) / ~10% (v7x, 3.2 TB/s HBM) of the write time."""
    def blk(bb, ft, hwt):
        return bb * 2 * ft * hwt * 4

    valid_f = [d for d in _divisors(F) if d == F or d % 8 == 0]
    HWt = HW
    fitting_f = [d for d in valid_f if blk(1, d, HWt) <= budget_bytes]
    if fitting_f:
        Ft = max(fitting_f)
    else:
        # Huge H*W: split the lane dim too, keeping multiples of 128 lanes so
        # stores stay unmasked full-width vst.
        Ft = min(valid_f)
        valid_hw = [d for d in _divisors(HW) if d == HW or d % 128 == 0]
        fitting_hw = [d for d in valid_hw if blk(1, Ft, d) <= budget_bytes]
        HWt = max(fitting_hw) if fitting_hw else min(valid_hw)
    fitting_b = [d for d in _divisors(B) if blk(d, Ft, HWt) <= budget_bytes]
    Bb = max(fitting_b) if fitting_b else 1
    return Bb, Ft, HWt


def position_embedding_sine(mask, num_pos_feats=64, temperature=10000,
                            normalize=False, scale=None,
                            assume_binary_mask=True):
    """mask: (B, H, W). Returns pos: (B, 2*num_pos_feats, H, W) float32.

    assume_binary_mask=True runs the pass-1 MXU cumsums in bf16 (exact for 0/1
    masks, ~3-4x cheaper than f32 matmul on all generations); pass False if a
    non-binary float mask might be supplied.
    """
    if scale is not None and normalize is False:
        raise ValueError("normalize should be True if scale is passed")
    if scale is None:
        scale = 2 * math.pi

    B, H, W = mask.shape
    F = num_pos_feats
    HW = H * W

    # torch cumsum(dtype=float32) semantics. Floating masks go in unchanged
    # (the cast to the matmul dtype happens inside the pass-1 kernel); only
    # bool/int masks need a wrapper-level cast.
    if not jnp.issubdtype(mask.dtype, jnp.floating):
        mask = mask.astype(jnp.float32)
    compute_dtype = jnp.bfloat16 if assume_binary_mask else jnp.float32

    # --- pass 1: cumsums (+ optional normalization) -> fused (B, 2, H, W) ---
    yx = _cumsum_embeds(mask, normalize, scale, compute_dtype)

    # Free row-major view into the lane-dense pass-2 layout; axis 1: 0=y, 1=x.
    emb = yx.reshape(B, 2, 1, HW)

    # Per-channel 1/dim_t (multiply instead of divide) + phase trick:
    # even c -> sin(e/dim_t[c]); odd c -> cos(e/dim_t[c]) = sin(e/dim_t[c]+pi/2).
    c = np.arange(F, dtype=np.float32)
    dim_t = (temperature ** (2.0 * np.floor(c / 2.0) / F)).astype(np.float32)
    inv_dim_t = jnp.asarray((1.0 / dim_t).reshape(1, 1, F, 1))
    phase = jnp.asarray(((c % 2) * (np.pi / 2.0)).astype(np.float32)
                        .reshape(1, 1, F, 1))

    Bb, Ft, HWt = _pick_tiles(B, F, HW)
    out_blk = Bb * 2 * Ft * HWt * 4
    emb_blk = Bb * 2 * 1 * HWt * 4
    vmem_need = 2 * (out_blk + emb_blk) + 4 * (2 * Ft * 4)

    # Advisory hint so XLA schedules neighbours around the dominant kernel.
    n_out = B * 2 * F * HW
    cost = pl.CostEstimate(
        flops=2 * n_out,
        transcendentals=n_out,
        bytes_accessed=4 * (n_out + B * 2 * HW + 4 * F),
    )

    out = pl.pallas_call(
        _sincos_kernel,
        out_shape=jax.ShapeDtypeStruct((B, 2, F, HW), jnp.float32),
        grid_spec=pltpu.PrefetchScalarGridSpec(
            num_scalar_prefetch=0,
            grid=(B // Bb, F // Ft, HW // HWt),
            in_specs=[
                pl.BlockSpec((Bb, 2, 1, HWt), lambda i, f, p: (i, 0, 0, p)),
                pl.BlockSpec((1, 1, Ft, 1), lambda i, f, p: (0, 0, f, 0)),
                pl.BlockSpec((1, 1, Ft, 1), lambda i, f, p: (0, 0, f, 0)),
            ],
            out_specs=pl.BlockSpec((Bb, 2, Ft, HWt),
                                   lambda i, f, p: (i, 0, f, p)),
        ),
        compiler_params=_compiler_params(
            ("parallel", "parallel", "parallel"), vmem_need),
        cost_estimate=cost,
    )(emb, inv_dim_t, phase)

    # Free reshape back to NCHW; channel order = [pos_y(F), pos_x(F)], matching
    # torch.cat((pos_y, pos_x), dim=3).permute(0, 3, 1, 2).
    # TODO(synk): if H*W < 128 (tiny feature maps) a (.., F*HW)-lane layout
    # would avoid masked partial stores; not needed for the shapes used here.
    return out.reshape(B, 2 * F, H, W)


# ---------------------------------------------------------------------------
# Pure-JAX mirror of the torch forward (correctness check only).
# ---------------------------------------------------------------------------
def reference_pos_embed(mask, num_pos_feats, temperature, normalize, scale):
    B, H, W = mask.shape
    y_embed = jnp.cumsum(mask.astype(jnp.float32), axis=1)
    x_embed = jnp.cumsum(mask.astype(jnp.float32), axis=2)
    if normalize:
        eps = 1e-6
        y_embed = y_embed / (y_embed[:, -1:, :] + eps) * scale
        x_embed = x_embed / (x_embed[:, :, -1:] + eps) * scale
    dim_t = jnp.arange(num_pos_feats, dtype=jnp.float32)
    dim_t = temperature ** (2.0 * jnp.floor(dim_t / 2.0) / num_pos_feats)
    pos_x = x_embed[:, :, :, None] / dim_t
    pos_y = y_embed[:, :, :, None] / dim_t
    pos_x = jnp.stack((jnp.sin(pos_x[..., 0::2]), jnp.cos(pos_x[..., 1::2])),
                      axis=4).reshape(B, H, W, -1)
    pos_y = jnp.stack((jnp.sin(pos_y[..., 0::2]), jnp.cos(pos_y[..., 1::2])),
                      axis=4).reshape(B, H, W, -1)
    pos = jnp.concatenate((pos_y, pos_x), axis=3).transpose(0, 3, 1, 2)
    return pos


if __name__ == "__main__":
    key = jax.random.PRNGKey(0)
    B, H, W = 2, 16, 16
    F = 32  # num_pos_feats -> output channels = 2 * F = 64

    mask = (jax.random.uniform(key, (B, H, W)) > 0.3).astype(jnp.float32)

    # default config: normalize=False (bf16 MXU path, exact for binary masks)
    pos = jax.block_until_ready(position_embedding_sine(mask, num_pos_feats=F))
    ref = reference_pos_embed(mask, F, 10000, False, 2 * math.pi)
    np.testing.assert_allclose(np.asarray(pos), np.asarray(ref),
                               rtol=1e-3, atol=1e-3)

    # normalized variant (scale = 2*pi default)
    pos_n = jax.block_until_ready(
        position_embedding_sine(mask, num_pos_feats=F, normalize=True))
    ref_n = reference_pos_embed(mask, F, 10000, True, 2 * math.pi)
    np.testing.assert_allclose(np.asarray(pos_n), np.asarray(ref_n),
                               rtol=1e-3, atol=1e-3)

    # non-binary float mask -> exact f32 matmul path
    soft_mask = jax.random.uniform(jax.random.PRNGKey(1), (B, H, W))
    pos_s = jax.block_until_ready(
        position_embedding_sine(soft_mask, num_pos_feats=F, normalize=True,
                                assume_binary_mask=False))
    ref_s = reference_pos_embed(soft_mask, F, 10000, True, 2 * math.pi)
    np.testing.assert_allclose(np.asarray(pos_s), np.asarray(ref_s),
                               rtol=1e-3, atol=1e-3)

    assert pos.shape == (B, 2 * F, H, W)
    print("KERNEL_OK")
</pallas_src>

<mosaic_0001>
module attributes {stable_mosaic.version = 11 : i64} {
  func.func @kernel(%arg0: i32, %arg1: memref<2x16x16xf32, #tpu.memory_space<vmem>>, %arg2: memref<16x16xbf16, #tpu.memory_space<vmem>>, %arg3: memref<16x16xbf16, #tpu.memory_space<vmem>>, %arg4: memref<2x2x16x16xf32, #tpu.memory_space<vmem>>) attributes {dimension_semantics = [#tpu.dimension_semantics<parallel>], iteration_bounds = array<i64: 1>, scalar_prefetch = 0 : i64, scratch_operands = 0 : i64, tpu.core_type = #tpu.core_type<tc>, window_params = [{transform_indices = @transform_0, window_bounds = array<i64: 2, 16, 16>}, {pipeline_mode = #tpu.pipeline_mode<synchronous>, transform_indices = @transform_1, window_bounds = array<i64: 16, 16>}, {pipeline_mode = #tpu.pipeline_mode<synchronous>, transform_indices = @transform_2, window_bounds = array<i64: 16, 16>}, {transform_indices = @transform_3, window_bounds = array<i64: 2, 2, 16, 16>}]} {
    %c0 = arith.constant 0 : index
    %c0_0 = arith.constant 0 : index
    %c0_1 = arith.constant 0 : index
    %0 = vector.load %arg1[%c0, %c0_0, %c0_1] : memref<2x16x16xf32, #tpu.memory_space<vmem>>, vector<2x16x16xf32>
    %1 = arith.truncf %0 : vector<2x16x16xf32> to vector<2x16x16xbf16>
    %2 = vector.shape_cast %1 : vector<2x16x16xbf16> to vector<32x16xbf16>
    %c0_2 = arith.constant 0 : index
    %c0_3 = arith.constant 0 : index
    %3 = vector.load %arg3[%c0_2, %c0_3] : memref<16x16xbf16, #tpu.memory_space<vmem>>, vector<16x16xbf16>
    %cst = arith.constant dense<0.000000e+00> : vector<32x16xf32>
    %4 = tpu.matmul %2, %3, %cst {dimension_numbers = #tpu.dot_dimension_numbers<[1], [0], [0], [1], [0, 0, 1, 1], [], []>} : vector<32x16xbf16>, vector<16x16xbf16>, vector<32x16xf32> -> vector<32x16xf32>
    %5 = vector.shape_cast %4 : vector<32x16xf32> to vector<2x16x16xf32>
    %c0_4 = arith.constant 0 : index
    %c0_5 = arith.constant 0 : index
    %6 = vector.load %arg2[%c0_4, %c0_5] : memref<16x16xbf16, #tpu.memory_space<vmem>>, vector<16x16xbf16>
    %7 = vector.extract_strided_slice %1 {offsets = [0, 0, 0], sizes = [1, 16, 16], strides = [1, 1, 1]} : vector<2x16x16xbf16> to vector<1x16x16xbf16>
    %8 = vector.shape_cast %7 : vector<1x16x16xbf16> to vector<16x16xbf16>
    %cst_6 = arith.constant dense<0.000000e+00> : vector<16x16xf32>
    %9 = tpu.matmul %6, %8, %cst_6 {dimension_numbers = #tpu.dot_dimension_numbers<[1], [0], [0], [1], [0, 0, 1, 1], [], []>} : vector<16x16xbf16>, vector<16x16xbf16>, vector<16x16xf32> -> vector<16x16xf32>
    %c0_7 = arith.constant 0 : index
    %c0_8 = arith.constant 0 : index
    %c0_9 = arith.constant 0 : index
    %c0_10 = arith.constant 0 : index
    %10 = vector.load %arg4[%c0_7, %c0_8, %c0_9, %c0_10] : memref<2x2x16x16xf32, #tpu.memory_space<vmem>>, vector<1x1x16x16xf32>
    %11 = vector.shape_cast %10 : vector<1x1x16x16xf32> to vector<16x16xf32>
    %12 = vector.shape_cast %9 : vector<16x16xf32> to vector<1x1x16x16xf32>
    tpu.vector_store %arg4[%c0_7, %c0_8, %c0_9, %c0_10], %12 {strides = array<i32>} : memref<2x2x16x16xf32, #tpu.memory_space<vmem>>, vector<1x1x16x16xf32>,
    %13 = vector.extract_strided_slice %5 {offsets = [0, 0, 0], sizes = [1, 16, 16], strides = [1, 1, 1]} : vector<2x16x16xf32> to vector<1x16x16xf32>
    %14 = vector.shape_cast %13 : vector<1x16x16xf32> to vector<16x16xf32>
    %c0_11 = arith.constant 0 : index
    %c1 = arith.constant 1 : index
    %c0_12 = arith.constant 0 : index
    %c0_13 = arith.constant 0 : index
    %15 = vector.load %arg4[%c0_11, %c1, %c0_12, %c0_13] : memref<2x2x16x16xf32, #tpu.memory_space<vmem>>, vector<1x1x16x16xf32>
    %16 = vector.shape_cast %15 : vector<1x1x16x16xf32> to vector<16x16xf32>
    %17 = vector.shape_cast %14 : vector<16x16xf32> to vector<1x1x16x16xf32>
    tpu.vector_store %arg4[%c0_11, %c1, %c0_12, %c0_13], %17 {strides = array<i32>} : memref<2x2x16x16xf32, #tpu.memory_space<vmem>>, vector<1x1x16x16xf32>,
    %c0_14 = arith.constant 0 : index
    %c0_15 = arith.constant 0 : index
    %18 = vector.load %arg2[%c0_14, %c0_15] : memref<16x16xbf16, #tpu.memory_space<vmem>>, vector<16x16xbf16>
    %19 = vector.extract_strided_slice %1 {offsets = [1, 0, 0], sizes = [1, 16, 16], strides = [1, 1, 1]} : vector<2x16x16xbf16> to vector<1x16x16xbf16>
    %20 = vector.shape_cast %19 : vector<1x16x16xbf16> to vector<16x16xbf16>
    %cst_16 = arith.constant dense<0.000000e+00> : vector<16x16xf32>
    %21 = tpu.matmul %18, %20, %cst_16 {dimension_numbers = #tpu.dot_dimension_numbers<[1], [0], [0], [1], [0, 0, 1, 1], [], []>} : vector<16x16xbf16>, vector<16x16xbf16>, vector<16x16xf32> -> vector<16x16xf32>
    %c1_17 = arith.constant 1 : index
    %c0_18 = arith.constant 0 : index
    %c0_19 = arith.constant 0 : index
    %c0_20 = arith.constant 0 : index
    %22 = vector.load %arg4[%c1_17, %c0_18, %c0_19, %c0_20] : memref<2x2x16x16xf32, #tpu.memory_space<vmem>>, vector<1x1x16x16xf32>
    %23 = vector.shape_cast %22 : vector<1x1x16x16xf32> to vector<16x16xf32>
    %24 = vector.shape_cast %21 : vector<16x16xf32> to vector<1x1x16x16xf32>
    tpu.vector_store %arg4[%c1_17, %c0_18, %c0_19, %c0_20], %24 {strides = array<i32>} : memref<2x2x16x16xf32, #tpu.memory_space<vmem>>, vector<1x1x16x16xf32>,
    %25 = vector.extract_strided_slice %5 {offsets = [1, 0, 0], sizes = [1, 16, 16], strides = [1, 1, 1]} : vector<2x16x16xf32> to vector<1x16x16xf32>
    %26 = vector.shape_cast %25 : vector<1x16x16xf32> to vector<16x16xf32>
    %c1_21 = arith.constant 1 : index
    %c1_22 = arith.constant 1 : index
    %c0_23 = arith.constant 0 : index
    %c0_24 = arith.constant 0 : index
    %27 = vector.load %arg4[%c1_21, %c1_22, %c0_23, %c0_24] : memref<2x2x16x16xf32, #tpu.memory_space<vmem>>, vector<1x1x16x16xf32>
    %28 = vector.shape_cast %27 : vector<1x1x16x16xf32> to vector<16x16xf32>
    %29 = vector.shape_cast %26 : vector<16x16xf32> to vector<1x1x16x16xf32>
    tpu.vector_store %arg4[%c1_21, %c1_22, %c0_23, %c0_24], %29 {strides = array<i32>} : memref<2x2x16x16xf32, #tpu.memory_space<vmem>>, vector<1x1x16x16xf32>,
    return
  }
  func.func @transform_0(%arg0: i32) -> (i32, i32, i32) {
    %c0_i32 = arith.constant 0 : i32
    %c0_i32_0 = arith.constant 0 : i32
    %c0_i32_1 = arith.constant 0 : i32
    return %arg0, %c0_i32, %c0_i32_0 : i32, i32, i32
  }
  func.func @transform_1(%arg0: i32) -> (i32, i32) {
    %c0_i32 = arith.constant 0 : i32
    %c0_i32_0 = arith.constant 0 : i32
    %c0_i32_1 = arith.constant 0 : i32
    return %c0_i32, %c0_i32_0 : i32, i32
  }
  func.func @transform_2(%arg0: i32) -> (i32, i32) {
    %c0_i32 = arith.constant 0 : i32
    %c0_i32_0 = arith.constant 0 : i32
    %c0_i32_1 = arith.constant 0 : i32
    return %c0_i32, %c0_i32_0 : i32, i32
  }
  func.func @transform_3(%arg0: i32) -> (i32, i32, i32, i32) {
    %c0_i32 = arith.constant 0 : i32
    %c0_i32_0 = arith.constant 0 : i32
    %c0_i32_1 = arith.constant 0 : i32
    %c0_i32_2 = arith.constant 0 : i32
    return %arg0, %c0_i32, %c0_i32_0, %c0_i32_1 : i32, i32, i32, i32
  }
}

</mosaic_0001>

<bundles_post_ra>
// kernel: tpu_custom_call.1
= control target key start
LH: loop header
LB: loop body
LE: loop exit
PB: predicated region body
PF: predicated region fallthrough
CT: control target
= control target key end

     0   :  { %8 = vsyncpa [#allocation3], 0  ;;  %s501_s0 = inlined_call_operand.hbm [shape: f32[2,16,16], index: 0, kind: input, shape index: {}]   ;;  %s502_s1 = inlined_call_operand.hbm [shape: bf16[16,16], index: 1, kind: input, shape index: {}]   ;;  %s503_s2 = inlined_call_operand.hbm [shape: bf16[16,16], index: 2, kind: input, shape index: {}]   ;;  %s504_s3 = inlined_call_operand.hbm [shape: f32[2,2,16,16], index: 3, kind: output, shape index: {}]  }
   0x1   :  { %9 = vsyncpa [#allocation6], 0 }
   0x2   :  { %10 = vsyncpa [#allocation4], 0  ;;  %s397_s12 = smov [#allocation5]   ;;  %s303_s16 = scalar_lea.hbm %s502_s1, 128 }
   0x3   :  { %s28_s13 = sshll.u32 %s397_s12, 4  ;;  %p304_p0 = scmp.ne.s32.totalorder %s502_s1, %s303_s16  ;;  %s29_s13 = int_to_ptr.vmem [resolvable:$true] %s28_s13 }
   0x4   :  { %p307_p1 = scmp.lt.u32.totalorder %s303_s16, %s502_s1 }
   0x6   :  { %p309_p2 = pnand %p307_p1, %p304_p0 }
   0x8   :  { %312 = shalt.err (!%p309_p2)
}
   0x9   :  { %s313_s21 = scalar_lea.vmem %s29_s13, 128  ;;  %p318_p4 = scmp.lt.s32.totalorder %s29_s13, %s29_s13 }
   0xa   :  { %p314_p3 = scmp.ne.s32.totalorder %s29_s13, %s313_s21  ;;  %p319_p5 = scmp.lt.s32.totalorder %s313_s21, %s313_s21 }
   0xc   :  { %p320_p6 = por %p319_p5, %p318_p4 }
   0xe   :  { %p321_p7 = pnand %p320_p6, %p314_p3 }
  0x10   :  { %324 = shalt.err (!%p321_p7)
}
  0x11   :  { %s398_s22 = smov 64   ;;  %s399_s23 = smov 4  }
  0x12   :  { %34 = dma.hbm_to_vmem [thread:$0]  %s502_s1, 128, %s29_s13, [#allocation6], %s398_s22, %s398_s22, %s399_s23  }
  0x13   :  { %s400_s26 = smov [#allocation2]   ;;  %s325_s30 = scalar_lea.hbm %s501_s0, 512 }
  0x14   :  { %s16_s27 = sshll.u32 %s400_s26, 4  ;;  %p326_p8 = scmp.ne.s32.totalorder %s501_s0, %s325_s30  ;;  %s17_s27 = int_to_ptr.vmem [resolvable:$true] %s16_s27 }
  0x15   :  { %p329_p9 = scmp.lt.u32.totalorder %s325_s30, %s501_s0 }
  0x17   :  { %p331_p10 = pnand %p329_p9, %p326_p8 }
  0x19   :  { %334 = shalt.err (!%p331_p10)
}
  0x1a   :  { %s335_s8 = scalar_lea.vmem %s17_s27, 512  ;;  %p340_p12 = scmp.lt.s32.totalorder %s17_s27, %s17_s27 }
  0x1b   :  { %p336_p11 = scmp.ne.s32.totalorder %s17_s27, %s335_s8  ;;  %p341_p13 = scmp.lt.s32.totalorder %s335_s8, %s335_s8 }
  0x1d   :  { %p342_p0 = por %p341_p13, %p340_p12 }
  0x1f   :  { %p343_p1 = pnand %p342_p0, %p336_p11 }
  0x21   :  { %346 = shalt.err (!%p343_p1)
}
  0x22   :  { %s401_s1 = smov 128   ;;  %s402_s9 = smov 8  }
  0x23   :  { %22 = dma.hbm_to_vmem [thread:$0]  %s501_s0, 512, %s17_s27, [#allocation3], %s401_s1, %s401_s1, %s402_s9  }
  0x24   :  { %s403_s12 = smov [#allocation7]   ;;  %s347_s16 = scalar_lea.hbm %s503_s2, 128 }
  0x25   :  { %s40_s13 = sshll.u32 %s403_s12, 4  ;;  %p348_p2 = scmp.ne.s32.totalorder %s503_s2, %s347_s16  ;;  %s41_s13 = int_to_ptr.vmem [resolvable:$true] %s40_s13 }
  0x26   :  { %p351_p3 = scmp.lt.u32.totalorder %s347_s16, %s503_s2 }
  0x28   :  { %p353_p4 = pnand %p351_p3, %p348_p2 }
  0x2a   :  { %356 = shalt.err (!%p353_p4)
}
  0x2b   :  { %s357_s21 = scalar_lea.vmem %s41_s13, 128  ;;  %p362_p6 = scmp.lt.s32.totalorder %s41_s13, %s41_s13 }
  0x2c   :  { %p358_p5 = scmp.ne.s32.totalorder %s41_s13, %s357_s21  ;;  %p363_p7 = scmp.lt.s32.totalorder %s357_s21, %s357_s21 }
  0x2e   :  { %p364_p8 = por %p363_p7, %p362_p6 }
  0x30   :  { %p365_p9 = pnand %p364_p8, %p358_p5 }
  0x32   :  { %368 = shalt.err (!%p365_p9)
}
  0x33   :  { %46 = dma.hbm_to_vmem [thread:$0]  %s503_s2, 128, %s41_s13, [#allocation6], %s398_s22, %s398_s22, %s399_s23  }
  0x34   :  { %391 = dma.done.wait [#allocation3], 512  }
  0x35   :  { %392 = vsyncadd [#allocation3], 4294966784 }
  0x36   :  { %393 = dma.done.wait [#allocation6], 256  }
  0x37   :  { %394 = vsyncadd [#allocation6], 4294967040  ;;  %v404_v0 = vmov 0.0   ;;  %vm405_vm0 = vmmov 0   ;;  %v300_v1 = vld [vmem:[#allocation7] sm:$0xff]   ;;  %v57_v2 = vld [vmem:[#allocation2] sm:$0xff] }
  0x38   :  { %278 = vmatprep.subr.bf16.mxu1 %v404_v0  ;;  %280 = vmatprep.mubr.msk.bf16.mxu1 %vm405_vm0, %v404_v0  ;;  %v58_v3 = vld [vmem:[#allocation2 + $0x8] sm:$0xff]  ;;  %vm71_vm1 = vcmask 130048   ;;  %v59_v4 = vld [vmem:[#allocation2 + $0x10] sm:$0xff]  ;;  %v60_v6 = vld [vmem:[#allocation2 + $0x18] sm:$0xff]  ;;  %s406_s2 = smov [#allocation8]  }
  0x39   :  { %272 = vmatprep.subr.bf16.mxu0 %v300_v1  ;;  %v61_v5 = vpack.c.bf16 %v58_v3, %v57_v2  ;;  %v62_v7 = vpack.c.bf16 %v60_v6, %v59_v4  ;;  %v301_v8 = vld [vmem:[#allocation5] sm:$0xff]   ;;  %s245_s22 = sshll.u32 %s406_s2, 4  ;;  %s246_s22 = int_to_ptr.vmem [resolvable:$true] %s245_s22 }
  0x3a   :  { %273 = vmatpush3.bf16.msra.mxu0 %v300_v1  ;;  %v302_v9 = vld [vmem:[#allocation5] sm:$0xff]   ;;  %s369_s23 = scalar_lea.vmem %s246_s22, 1024  ;;  %p374_p11 = scmp.lt.s32.totalorder %s246_s22, %s246_s22 }
  0x3b   :  { %274 = vmatprep.mubr.msk.bf16.mxu0 %vm71_vm1, %v61_v5  ;;  %284 = vmatprep.subr.bf16.mxu0 %v404_v0  ;;  %p370_p10 = scmp.ne.s32.totalorder %s246_s22, %s369_s23  ;;  %p375_p12 = scmp.lt.s32.totalorder %s369_s23, %s369_s23 }
  0x3c   :  { %279 = vmatpush3.bf16.msra.mxu1 %v61_v5 }
  0x3d   :  { %275 = vmatmul.mubr.msk.bf16.vlgmr.msra.gmra.mrb[0].mxu0 %vm71_vm1, %v62_v7  ;;  %p376_p13 = por %p375_p12, %p374_p11 }
  0x3e   :  { %285 = vmatpush3.bf16.msra.mxu0 %v62_v7  ;;  %286 = vmatprep.mubr.msk.bf16.mxu0 %vm405_vm0, %v404_v0 }
  0x3f   :  { %281 = vmatmul.mubr.msk.bf16.vlgmr.msra.gmra.mrb[0].mxu1 %vm71_vm1, %v301_v8  ;;  %p377_p0 = pnand %p376_p13, %p370_p10 }
  0x45   :  { %287 = vmatmul.mubr.msk.bf16.vlgmr.msra.gmra.mrb[4].mxu0 %vm71_vm1, %v302_v9 }
 0x110   :  { %v276_v10 = vpop.f32.mrb[0].mxu0 }
 0x111   :  { %238 = vst.msk [vmem:[#allocation8 + $0x30] sm:$0xff] %vm71_vm1, %v276_v10  ;;  %v112_v11 = vpop.f32.mrb[1].mxu0 }
 0x112   :  { %181 = vst.msk [vmem:[#allocation8 + $0x10] sm:$0xff] %vm71_vm1, %v112_v11  ;;  %v277_v12 = vpop.f32.mrb[2].mxu0  ;;  %v171_v13 = vpop.f32.mrb[0].mxu1 }
 0x113   :  { %239 = vst.msk [vmem:[#allocation8 + $0x38] sm:$0xff] %vm71_vm1, %v277_v12  ;;  %v115_v14 = vpop.f32.mrb[3].mxu0  ;;  %178 = vst.msk [vmem:[#allocation8] sm:$0xff] %vm71_vm1, %v171_v13  ;;  %v282_v15 = vpop.f32.mrb[1].mxu1 }
 0x114   :  { %182 = vst.msk [vmem:[#allocation8 + $0x18] sm:$0xff] %vm71_vm1, %v115_v14  ;;  %v174_v16 = vpop.f32.mrb[2].mxu1 }
 0x115   :  { %179 = vst.msk [vmem:[#allocation8 + $0x8] sm:$0xff] %vm71_vm1, %v174_v16  ;;  %v283_v17 = vpop.f32.mrb[3].mxu1 }
 0x118   :  { %v227_v18 = vpop.f32.mrb[4].mxu0 }
 0x119   :  { %235 = vst.msk [vmem:[#allocation8 + $0x20] sm:$0xff] %vm71_vm1, %v227_v18  ;;  %v288_v19 = vpop.f32.mrb[5].mxu0 }
 0x11a   :  { %v230_v20 = vpop.f32.mrb[6].mxu0 }
 0x11b   :  { %236 = vst.msk [vmem:[#allocation8 + $0x28] sm:$0xff] %vm71_vm1, %v230_v20  ;;  %v289_v21 = vpop.f32.mrb[7].mxu0 }
 0x11c   :  { %380 = shalt.err (!%p377_p0)
}
 0x11d   :  { %s381_s27 = scalar_lea.hbm %s504_s3, 1024 }
 0x11e   :  { %p382_p1 = scmp.ne.s32.totalorder %s504_s3, %s381_s27  ;;  %p385_p2 = scmp.lt.u32.totalorder %s381_s27, %s504_s3 }
 0x120   :  { %p387_p3 = pnand %p385_p2, %p382_p1 }
 0x122   :  { %390 = shalt.err (!%p387_p3)
}
 0x123   :  { %251 = dma.vmem_to_hbm [thread:$0]  %s246_s22, 1024, %s504_s3, [#allocation4], %s401_s1, %s401_s1, %s402_s9  }
 0x124   :  { %395 = dma.done.wait [#allocation4], 1024  }
 0x125   :  { %396 = vsyncadd [#allocation4], 4294966272 }
 0x126   :  { %255 = vsyncpa [#allocation3], 1 }
 0x127   :  { %256 = vsyncpa [#allocation6], 1 }
 0x128   :  { %257 = vsyncpa [#allocation4], 1 }

</bundles_post_ra>
